<compile_context>
chip_gen: v7x
topology: tpu7x:2x2x1
jax: 0.10.0
libtpu: 0.0.40
codegen_flags: <defaults>
</compile_context>

<pallas_src>
import numpy as np
import jax
import jax.numpy as jnp
from jax.experimental import pallas as pl
from jax.experimental.pallas import tpu as pltpu

# ---------------- configuration (small synthetic shapes) ----------------
N = 2            # batch
C_IN = 8         # in_channels
CH = 16          # channels per pyramid stage
H = W = 16       # spatial
SIZES = (1, 2, 3, 6)
NUM_STAGES = len(SIZES)
HW = H * W                                                  # 256
S_CH = NUM_STAGES * CH                                      # 64
CELL_COUNTS = tuple(s * s for s in SIZES)                   # (1, 4, 9, 36)
CELL_OFFSETS = tuple(int(o) for o in np.cumsum((0,) + CELL_COUNTS[:-1]))  # (0,1,5,14)
TOTAL_CELLS = sum(CELL_COUNTS)                              # 50
CELLS_PAD = 64                                              # packed cell axis, one lane tile


# ---------------- glue: pooling / upsampling matrices ----------------
def adaptive_pool_matrix(in_size, out_size):
    """1D adaptive-avg-pool matrix (out_size, in_size), PyTorch semantics."""
    P = np.zeros((out_size, in_size), dtype=np.float32)
    for i in range(out_size):
        start = (i * in_size) // out_size
        end = -(-((i + 1) * in_size) // out_size)  # ceil
        P[i, start:end] = 1.0 / (end - start)
    return P


def bilinear_up_matrix(out_size, in_size):
    """1D bilinear upsample matrix (out_size, in_size), align_corners=False."""
    U = np.zeros((out_size, in_size), dtype=np.float32)
    scale = in_size / out_size
    for o in range(out_size):
        src = max((o + 0.5) * scale - 0.5, 0.0)
        i0 = min(int(np.floor(src)), in_size - 1)
        i1 = min(i0 + 1, in_size - 1)
        l1 = src - i0
        U[o, i0] += 1.0 - l1
        U[o, i1] += l1
    return U


def build_geometry():
    """Packed, pre-transposed geometry for the fused kernel.

    poolT : (HW, CELLS_PAD)    pooledT = xT @ poolT  (cells packed per stage)
    upT   : (CELLS_PAD, HW)    accT  += contrib @ upT
    mask  : (S_CH, CELLS_PAD)  1 on (stage row block, valid cell of same stage)
    """
    poolT = np.zeros((HW, CELLS_PAD), np.float32)
    upT = np.zeros((CELLS_PAD, HW), np.float32)
    mask = np.zeros((S_CH, CELLS_PAD), np.float32)
    for si, s in enumerate(SIZES):
        off = CELL_OFFSETS[si]
        Ph, Pw = adaptive_pool_matrix(H, s), adaptive_pool_matrix(W, s)
        Uh, Uw = bilinear_up_matrix(H, s), bilinear_up_matrix(W, s)
        for i in range(s):
            for j in range(s):
                cell = off + i * s + j
                poolT[:, cell] = np.outer(Ph[i], Pw[j]).reshape(-1)
                upT[cell, :] = np.outer(Uh[:, i], Uw[:, j]).reshape(-1)
        mask[si * CH:(si + 1) * CH, off:off + s * s] = 1.0
    return poolT, upT, mask


_POOLT_NP, _UPT_NP, _MASK_NP = build_geometry()


# ---------------- Pallas kernel ----------------
def ppm_kernel(x_ref, poolT_ref, upT_ref, mask_ref, wstack_ref, bstack_ref,
               wbstack_ref, wblast_ref, bb_ref, o_ref):
    # x_ref:       (nb, C_IN, HW)           batch block, HW on lanes (f32)
    # poolT_ref:   (HW, CELLS_PAD)          packed adaptive-pool matrices (bf16)
    # upT_ref:     (CELLS_PAD, HW)          packed bilinear-upsample matrices (bf16)
    # mask_ref:    (nb*S_CH, CELLS_PAD)     block-diag / valid-cell mask (f32)
    # wstack_ref:  (nb*S_CH, nb*C_IN)       kron(I_nb, stage 1x1-conv weights)
    # bstack_ref:  (nb*S_CH, 1)             tiled stage biases
    # wbstack_ref: (nb*C_IN, nb*S_CH)       kron(I_nb, bottleneck prior-channel chunk)
    # wblast_ref:  (nb*C_IN, nb*C_IN)       kron(I_nb, bottleneck raw-feature chunk)
    # bb_ref:      (nb*C_IN, 1)             tiled bottleneck bias
    nb, c_in, hw = x_ref.shape
    x2d = x_ref[...].reshape(nb * c_in, hw)                       # fold batch into M (reshape only)

    # (1) all adaptive avg pools for all batch rows: one lane-dense dot, bf16 in / f32 acc
    pooled = jnp.dot(x2d.astype(poolT_ref.dtype), poolT_ref[...],
                     preferred_element_type=jnp.float32)          # (nb*C_IN, CELLS_PAD)

    # (2) all stage 1x1 convs for all batch rows (block-diag weights); bias+ReLU+mask in f32.
    #     mask kills cross-stage blocks and padded cells.
    big = jnp.dot(wstack_ref[...], pooled, preferred_element_type=jnp.float32)
    big = jnp.maximum(big + bstack_ref[...], 0.0) * mask_ref[...]  # (nb*S_CH, CELLS_PAD)

    # (3) bottleneck prior-channel chunks, re-associated ahead of the upsample (linear)
    contrib = jnp.dot(wbstack_ref[...], big,
                      preferred_element_type=jnp.float32)          # (nb*C_IN, CELLS_PAD)

    # (4) raw-feature chunk + bias + single packed bilinear upsample, then final ReLU
    acc = (jnp.dot(wblast_ref[...], x2d, preferred_element_type=jnp.float32)
           + bb_ref[...]
           + jnp.dot(contrib.astype(upT_ref.dtype), upT_ref[...],
                     preferred_element_type=jnp.float32))          # (nb*C_IN, HW)
    o_ref[...] = jnp.maximum(acc, 0.0).reshape(nb, c_in, hw)       # lane-dense store


# ---------------- batch blocking ----------------
def _tensorcores_per_device():
    """TensorCores per JAX device (2 on megacore parts like v7x, else 1)."""
    try:
        return max(1, int(getattr(jax.devices()[0], "num_cores", 1) or 1))
    except Exception:
        return 1


def _pick_batch_block(n):
    """Batch rows folded into one grid step (= the matmul M dimension / C_IN).

    Keep enough grid steps to shard across TensorCores on megacore parts, but
    otherwise fold as much batch as possible so the MXU isn't starved at M=8.
    Capped at 8 so the block-diagonal weight stacks stay tiny.
    """
    cores = _tensorcores_per_device()
    nb = max(1, n // cores)
    nb = min(nb, 8, n)
    while n % nb:
        nb -= 1
    return nb


# ---------------- wrapper ----------------
def ppm_forward(x_nchw, Ws, bs, Wb, bbv):
    n, c, h, w = x_nchw.shape
    assert (c, h, w) == (C_IN, H, W)
    x_flat = x_nchw.reshape(n, c, h * w)          # NCHW -> (N, C, HW): reshape only, no transpose

    nb = _pick_batch_block(n)
    grid = (n // nb,)
    eye_nb = jnp.eye(nb, dtype=jnp.float32)

    # operand packing: bf16 geometry (dominant DMA bytes), block-diag / tiled weights
    poolT = jnp.asarray(_POOLT_NP, jnp.bfloat16)                 # (HW, CELLS_PAD)
    upT = jnp.asarray(_UPT_NP, jnp.bfloat16)                     # (CELLS_PAD, HW)
    mask_bd = jnp.tile(jnp.asarray(_MASK_NP), (nb, 1))           # (nb*S_CH, CELLS_PAD)
    wstack_bd = jnp.kron(eye_nb, Ws.reshape(S_CH, C_IN))         # (nb*S_CH, nb*C_IN)
    bstack_bd = jnp.tile(bs.reshape(S_CH, 1), (nb, 1))           # (nb*S_CH, 1)
    wbstack_bd = jnp.kron(eye_nb, Wb[:, :S_CH])                  # (nb*C_IN, nb*S_CH)
    wblast_bd = jnp.kron(eye_nb, Wb[:, S_CH:])                   # (nb*C_IN, nb*C_IN)
    bb_bd = jnp.tile(bbv.reshape(C_IN, 1), (nb, 1))              # (nb*C_IN, 1)

    operands = (x_flat, poolT, upT, mask_bd, wstack_bd, bstack_bd,
                wbstack_bd, wblast_bd, bb_bd)

    m = nb * C_IN
    flops = 2 * (n // nb) * (
        m * HW * CELLS_PAD               # packed adaptive pooling
        + (nb * S_CH) * m * CELLS_PAD    # stacked stage 1x1 convs (block-diag)
        + m * (nb * S_CH) * CELLS_PAD    # stacked bottleneck chunks (block-diag)
        + m * m * HW                     # bottleneck on raw features (block-diag)
        + m * CELLS_PAD * HW             # packed bilinear upsample
    )
    bytes_accessed = (sum(int(a.size) * a.dtype.itemsize for a in operands)
                      + n * C_IN * HW * 4)

    out_flat = pl.pallas_call(
        ppm_kernel,
        out_shape=jax.ShapeDtypeStruct((n, C_IN, HW), jnp.float32),
        grid=grid,
        in_specs=[
            pl.BlockSpec((nb, C_IN, HW), lambda b: (b, 0, 0)),
            pl.BlockSpec(poolT.shape, lambda b: (0, 0)),
            pl.BlockSpec(upT.shape, lambda b: (0, 0)),
            pl.BlockSpec(mask_bd.shape, lambda b: (0, 0)),
            pl.BlockSpec(wstack_bd.shape, lambda b: (0, 0)),
            pl.BlockSpec(bstack_bd.shape, lambda b: (0, 0)),
            pl.BlockSpec(wbstack_bd.shape, lambda b: (0, 0)),
            pl.BlockSpec(wblast_bd.shape, lambda b: (0, 0)),
            pl.BlockSpec(bb_bd.shape, lambda b: (0, 0)),
        ],
        out_specs=pl.BlockSpec((nb, C_IN, HW), lambda b: (b, 0, 0)),
        compiler_params=pltpu.CompilerParams(dimension_semantics=("parallel",)),
        cost_estimate=pl.CostEstimate(flops=int(flops), transcendentals=0,
                                      bytes_accessed=int(bytes_accessed)),
    )(*operands)

    return out_flat.reshape(n, C_IN, H, W)        # reshape only, no transpose


# ---------------- pure-JAX reference (straightforward per-stage math, f32) ----------------
def ppm_reference(x_nchw, Ws, bs_, Wb, bbv):
    priors = []
    for i, s in enumerate(SIZES):
        Ph, Pw = adaptive_pool_matrix(H, s), adaptive_pool_matrix(W, s)
        Uh, Uw = bilinear_up_matrix(H, s), bilinear_up_matrix(W, s)
        pooled = jnp.einsum("ph,qw,nchw->ncpq", Ph, Pw, x_nchw)            # adaptive avg pool
        feat = jnp.maximum(
            jnp.einsum("oc,ncpq->nopq", Ws[i], pooled) + bs_[i][None, :, None, None], 0.0)
        prior = jnp.einsum("hp,wq,nopq->nohw", Uh, Uw, feat)               # bilinear upsample
        priors.append(prior)
    cat = jnp.concatenate(priors + [x_nchw], axis=1)                       # torch.cat order
    out = jnp.maximum(
        jnp.einsum("oc,nchw->nohw", Wb, cat) + bbv[None, :, None, None], 0.0)
    return out


if __name__ == "__main__":
    key = jax.random.PRNGKey(0)
    k_x, k_ws, k_bs, k_wb, k_bb = jax.random.split(key, 5)

    # deterministic synthetic parameters (shapes follow the module __init__)
    x = jax.random.normal(k_x, (N, C_IN, H, W), jnp.float32)
    Ws = 0.1 * jax.random.normal(k_ws, (NUM_STAGES, CH, C_IN), jnp.float32)   # stage Conv2d(C_IN, CH, 1)
    bs = 0.1 * jax.random.normal(k_bs, (NUM_STAGES, CH), jnp.float32)
    Wb = 0.05 * jax.random.normal(k_wb, (C_IN, S_CH + C_IN), jnp.float32)     # bottleneck Conv2d(C_IN+4*CH, C_IN, 1)
    bbv = 0.05 * jax.random.normal(k_bb, (C_IN,), jnp.float32)

    out = ppm_forward(x, Ws, bs, Wb, bbv)
    out = jax.block_until_ready(out)

    ref = jax.block_until_ready(ppm_reference(x, Ws, bs, Wb, bbv))
    assert out.shape == (N, C_IN, H, W)
    # Tolerance reflects bf16 pool/upsample geometry with f32 accumulation
    # (observed error is a few 1e-3 absolute at these magnitudes).
    np.testing.assert_allclose(np.asarray(out), np.asarray(ref), rtol=2e-2, atol=2e-2)

    print("KERNEL_OK")
</pallas_src>

<mosaic_0001>
module attributes {stable_mosaic.version = 11 : i64} {
  func.func @ppm_kernel(%arg0: i32, %arg1: memref<2x8x256xf32, #tpu.memory_space<vmem>>, %arg2: memref<256x64xbf16, #tpu.memory_space<vmem>>, %arg3: memref<64x256xbf16, #tpu.memory_space<vmem>>, %arg4: memref<128x64xf32, #tpu.memory_space<vmem>>, %arg5: memref<128x16xf32, #tpu.memory_space<vmem>>, %arg6: memref<128x1xf32, #tpu.memory_space<vmem>>, %arg7: memref<16x128xf32, #tpu.memory_space<vmem>>, %arg8: memref<16x16xf32, #tpu.memory_space<vmem>>, %arg9: memref<16x1xf32, #tpu.memory_space<vmem>>, %arg10: memref<2x8x256xf32, #tpu.memory_space<vmem>>) attributes {dimension_semantics = [#tpu.dimension_semantics<parallel>], iteration_bounds = array<i64: 1>, scalar_prefetch = 0 : i64, scratch_operands = 0 : i64, tpu.core_type = #tpu.core_type<tc>, window_params = [{transform_indices = @transform_0, window_bounds = array<i64: 2, 8, 256>}, {pipeline_mode = #tpu.pipeline_mode<synchronous>, transform_indices = @transform_1, window_bounds = array<i64: 256, 64>}, {pipeline_mode = #tpu.pipeline_mode<synchronous>, transform_indices = @transform_2, window_bounds = array<i64: 64, 256>}, {pipeline_mode = #tpu.pipeline_mode<synchronous>, transform_indices = @transform_3, window_bounds = array<i64: 128, 64>}, {pipeline_mode = #tpu.pipeline_mode<synchronous>, transform_indices = @transform_4, window_bounds = array<i64: 128, 16>}, {pipeline_mode = #tpu.pipeline_mode<synchronous>, transform_indices = @transform_5, window_bounds = array<i64: 128, 1>}, {pipeline_mode = #tpu.pipeline_mode<synchronous>, transform_indices = @transform_6, window_bounds = array<i64: 16, 128>}, {pipeline_mode = #tpu.pipeline_mode<synchronous>, transform_indices = @transform_7, window_bounds = array<i64: 16, 16>}, {pipeline_mode = #tpu.pipeline_mode<synchronous>, transform_indices = @transform_8, window_bounds = array<i64: 16, 1>}, {transform_indices = @transform_9, window_bounds = array<i64: 2, 8, 256>}]} {
    %c0 = arith.constant 0 : index
    %c0_0 = arith.constant 0 : index
    %c0_1 = arith.constant 0 : index
    %0 = vector.load %arg1[%c0, %c0_0, %c0_1] : memref<2x8x256xf32, #tpu.memory_space<vmem>>, vector<2x8x256xf32>
    %1 = vector.shape_cast %0 : vector<2x8x256xf32> to vector<16x256xf32>
    %2 = arith.truncf %1 : vector<16x256xf32> to vector<16x256xbf16>
    %c0_2 = arith.constant 0 : index
    %c0_3 = arith.constant 0 : index
    %3 = vector.load %arg2[%c0_2, %c0_3] : memref<256x64xbf16, #tpu.memory_space<vmem>>, vector<256x64xbf16>
    %cst = arith.constant dense<0.000000e+00> : vector<16x64xf32>
    %4 = tpu.matmul %2, %3, %cst {dimension_numbers = #tpu.dot_dimension_numbers<[1], [0], [0], [1], [0, 0, 1, 1], [], []>} : vector<16x256xbf16>, vector<256x64xbf16>, vector<16x64xf32> -> vector<16x64xf32>
    %c0_4 = arith.constant 0 : index
    %c0_5 = arith.constant 0 : index
    %5 = vector.load %arg5[%c0_4, %c0_5] : memref<128x16xf32, #tpu.memory_space<vmem>>, vector<128x16xf32>
    %cst_6 = arith.constant dense<0.000000e+00> : vector<128x64xf32>
    %6 = tpu.matmul %5, %4, %cst_6 {dimension_numbers = #tpu.dot_dimension_numbers<[1], [0], [0], [1], [0, 0, 1, 1], [], []>} : vector<128x16xf32>, vector<16x64xf32>, vector<128x64xf32> -> vector<128x64xf32>
    %c0_7 = arith.constant 0 : index
    %c0_8 = arith.constant 0 : index
    %7 = vector.load %arg6[%c0_7, %c0_8] : memref<128x1xf32, #tpu.memory_space<vmem>>, vector<128x1xf32>
    %8 = vector.broadcast %7 : vector<128x1xf32> to vector<128x64xf32>
    %9 = arith.addf %6, %8 : vector<128x64xf32>
    %cst_9 = arith.constant 0.000000e+00 : f32
    %10 = vector.broadcast %cst_9 : f32 to vector<128x64xf32>
    %11 = arith.maximumf %9, %10 : vector<128x64xf32>
    %c0_10 = arith.constant 0 : index
    %c0_11 = arith.constant 0 : index
    %12 = vector.load %arg4[%c0_10, %c0_11] : memref<128x64xf32, #tpu.memory_space<vmem>>, vector<128x64xf32>
    %13 = arith.mulf %11, %12 : vector<128x64xf32>
    %c0_12 = arith.constant 0 : index
    %c0_13 = arith.constant 0 : index
    %14 = vector.load %arg7[%c0_12, %c0_13] : memref<16x128xf32, #tpu.memory_space<vmem>>, vector<16x128xf32>
    %cst_14 = arith.constant dense<0.000000e+00> : vector<16x64xf32>
    %15 = tpu.matmul %14, %13, %cst_14 {dimension_numbers = #tpu.dot_dimension_numbers<[1], [0], [0], [1], [0, 0, 1, 1], [], []>} : vector<16x128xf32>, vector<128x64xf32>, vector<16x64xf32> -> vector<16x64xf32>
    %c0_15 = arith.constant 0 : index
    %c0_16 = arith.constant 0 : index
    %16 = vector.load %arg8[%c0_15, %c0_16] : memref<16x16xf32, #tpu.memory_space<vmem>>, vector<16x16xf32>
    %cst_17 = arith.constant dense<0.000000e+00> : vector<16x256xf32>
    %17 = tpu.matmul %16, %1, %cst_17 {dimension_numbers = #tpu.dot_dimension_numbers<[1], [0], [0], [1], [0, 0, 1, 1], [], []>} : vector<16x16xf32>, vector<16x256xf32>, vector<16x256xf32> -> vector<16x256xf32>
    %c0_18 = arith.constant 0 : index
    %c0_19 = arith.constant 0 : index
    %18 = vector.load %arg9[%c0_18, %c0_19] : memref<16x1xf32, #tpu.memory_space<vmem>>, vector<16x1xf32>
    %19 = vector.broadcast %18 : vector<16x1xf32> to vector<16x256xf32>
    %20 = arith.addf %17, %19 : vector<16x256xf32>
    %21 = arith.truncf %15 : vector<16x64xf32> to vector<16x64xbf16>
    %c0_20 = arith.constant 0 : index
    %c0_21 = arith.constant 0 : index
    %22 = vector.load %arg3[%c0_20, %c0_21] : memref<64x256xbf16, #tpu.memory_space<vmem>>, vector<64x256xbf16>
    %cst_22 = arith.constant dense<0.000000e+00> : vector<16x256xf32>
    %23 = tpu.matmul %21, %22, %cst_22 {dimension_numbers = #tpu.dot_dimension_numbers<[1], [0], [0], [1], [0, 0, 1, 1], [], []>} : vector<16x64xbf16>, vector<64x256xbf16>, vector<16x256xf32> -> vector<16x256xf32>
    %24 = arith.addf %20, %23 : vector<16x256xf32>
    %cst_23 = arith.constant 0.000000e+00 : f32
    %25 = vector.broadcast %cst_23 : f32 to vector<16x256xf32>
    %26 = arith.maximumf %24, %25 : vector<16x256xf32>
    %27 = vector.shape_cast %26 : vector<16x256xf32> to vector<2x8x256xf32>
    %c0_24 = arith.constant 0 : index
    %c0_25 = arith.constant 0 : index
    %c0_26 = arith.constant 0 : index
    %28 = vector.load %arg10[%c0_24, %c0_25, %c0_26] : memref<2x8x256xf32, #tpu.memory_space<vmem>>, vector<2x8x256xf32>
    tpu.vector_store %arg10[%c0_24, %c0_25, %c0_26], %27 {strides = array<i32>} : memref<2x8x256xf32, #tpu.memory_space<vmem>>, vector<2x8x256xf32>,
    return
  }
  func.func @transform_0(%arg0: i32) -> (i32, i32, i32) {
    %c0_i32 = arith.constant 0 : i32
    %c0_i32_0 = arith.constant 0 : i32
    %c0_i32_1 = arith.constant 0 : i32
    return %arg0, %c0_i32, %c0_i32_0 : i32, i32, i32
  }
  func.func @transform_1(%arg0: i32) -> (i32, i32) {
    %c0_i32 = arith.constant 0 : i32
    %c0_i32_0 = arith.constant 0 : i32
    %c0_i32_1 = arith.constant 0 : i32
    return %c0_i32, %c0_i32_0 : i32, i32
  }
  func.func @transform_2(%arg0: i32) -> (i32, i32) {
    %c0_i32 = arith.constant 0 : i32
    %c0_i32_0 = arith.constant 0 : i32
    %c0_i32_1 = arith.constant 0 : i32
    return %c0_i32, %c0_i32_0 : i32, i32
  }
  func.func @transform_3(%arg0: i32) -> (i32, i32) {
    %c0_i32 = arith.constant 0 : i32
    %c0_i32_0 = arith.constant 0 : i32
    %c0_i32_1 = arith.constant 0 : i32
    return %c0_i32, %c0_i32_0 : i32, i32
  }
  func.func @transform_4(%arg0: i32) -> (i32, i32) {
    %c0_i32 = arith.constant 0 : i32
    %c0_i32_0 = arith.constant 0 : i32
    %c0_i32_1 = arith.constant 0 : i32
    return %c0_i32, %c0_i32_0 : i32, i32
  }
  func.func @transform_5(%arg0: i32) -> (i32, i32) {
    %c0_i32 = arith.constant 0 : i32
    %c0_i32_0 = arith.constant 0 : i32
    %c0_i32_1 = arith.constant 0 : i32
    return %c0_i32, %c0_i32_0 : i32, i32
  }
  func.func @transform_6(%arg0: i32) -> (i32, i32) {
    %c0_i32 = arith.constant 0 : i32
    %c0_i32_0 = arith.constant 0 : i32
    %c0_i32_1 = arith.constant 0 : i32
    return %c0_i32, %c0_i32_0 : i32, i32
  }
  func.func @transform_7(%arg0: i32) -> (i32, i32) {
    %c0_i32 = arith.constant 0 : i32
    %c0_i32_0 = arith.constant 0 : i32
    %c0_i32_1 = arith.constant 0 : i32
    return %c0_i32, %c0_i32_0 : i32, i32
  }
  func.func @transform_8(%arg0: i32) -> (i32, i32) {
    %c0_i32 = arith.constant 0 : i32
    %c0_i32_0 = arith.constant 0 : i32
    %c0_i32_1 = arith.constant 0 : i32
    return %c0_i32, %c0_i32_0 : i32, i32
  }
  func.func @transform_9(%arg0: i32) -> (i32, i32, i32) {
    %c0_i32 = arith.constant 0 : i32
    %c0_i32_0 = arith.constant 0 : i32
    %c0_i32_1 = arith.constant 0 : i32
    return %arg0, %c0_i32, %c0_i32_0 : i32, i32, i32
  }
}

</mosaic_0001>

<bundles_post_ra>
// kernel: tpu_custom_call.1
= control target key start
LH: loop header
LB: loop body
LE: loop exit
PB: predicated region body
PF: predicated region fallthrough
CT: control target
= control target key end

     0   :  { %s1470_s0 = inlined_call_operand.vmem [shape: f32[2,8,256], index: 0, kind: input, shape index: {}]   ;;  %s1471_s1 = inlined_call_operand.vmem [shape: bf16[256,64], index: 1, kind: input, shape index: {}]   ;;  %s1472_s2 = inlined_call_operand.vmem [shape: bf16[64,256], index: 2, kind: input, shape index: {}]   ;;  %s1473_s3 = inlined_call_operand.vmem [shape: f32[128,64], index: 3, kind: input, shape index: {}]   ;;  %s1474_s4 = inlined_call_operand.vmem [shape: f32[128,16], index: 4, kind: input, shape index: {}]   ;;  %s1475_s5 = inlined_call_operand.vmem [shape: f32[128,1], index: 5, kind: input, shape index: {}]   ;;  %s1476_s6 = inlined_call_operand.vmem [shape: f32[16,128], index: 6, kind: input, shape index: {}]   ;;  %s1477_s7 = inlined_call_operand.vmem [shape: f32[16,16], index: 7, kind: input, shape index: {}]   ;;  %s1478_s8 = inlined_call_operand.vmem [shape: f32[16,1], index: 8, kind: input, shape index: {}]   ;;  %s1479_s9 = inlined_call_operand.hbm [shape: f32[2,8,256], index: 9, kind: output, shape index: {}]  }
   0x1   :  { %v1072_v0 = vld [vmem:[%s1471_s1 + $0x40] sm:$0xff]   ;;  %v1074_v2 = vld [vmem:[%s1471_s1 + $0x48] sm:$0xff]   ;;  %v1076_v4 = vld [vmem:[%s1471_s1 + $0x50] sm:$0xff]  }
   0x2   :  { %v1073_v1 = vld [vmem:[%s1471_s1] sm:$0xff]   ;;  %904 = vmatprep.subr.bf16.mxu0 %v1072_v0  ;;  %v1075_v3 = vld [vmem:[%s1471_s1 + $0x8] sm:$0xff]   ;;  %v1077_v5 = vld [vmem:[%s1471_s1 + $0x10] sm:$0xff]  }
   0x3   :  { %905 = vmatpush3.bf16.msra.mxu0 %v1073_v1  ;;  %v1078_v6 = vld [vmem:[%s1471_s1 + $0x58] sm:$0xff]   ;;  %v1080_v8 = vld [vmem:[%s1471_s1 + $0x60] sm:$0xff]   ;;  %v1082_v10 = vld [vmem:[%s1471_s1 + $0x68] sm:$0xff]  }
   0x4   :  { %906 = vmatprep.subr.bf16.mxu0 %v1074_v2  ;;  %v1079_v7 = vld [vmem:[%s1471_s1 + $0x18] sm:$0xff]   ;;  %v1081_v9 = vld [vmem:[%s1471_s1 + $0x20] sm:$0xff]   ;;  %v35_v11 = vld [vmem:[%s1470_s0 + $0x8] sm:$0xff] }
   0x5   :  { %v37_v12 = vld [vmem:[%s1470_s0 + $0x18] sm:$0xff]  ;;  %v1083_v13 = vld [vmem:[%s1471_s1 + $0x28] sm:$0xff]   ;;  %v1084_v15 = vld [vmem:[%s1471_s1 + $0x70] sm:$0xff]  }
   0x6   :  { %v39_v14 = vpack.c.bf16 %v37_v12, %v35_v11 }
   0x7   :  { %907 = vmatpush3.bf16.msra.mxu0 %v1075_v3 }
   0x8   :  { %908 = vmatprep.subr.bf16.mxu0 %v1076_v4  ;;  %200 = vmatprep.mubr.bf16.mxu0 %v39_v14 }
   0xb   :  { %909 = vmatpush3.bf16.msra.mxu0 %v1077_v5 }
   0xc   :  { %910 = vmatprep.subr.bf16.mxu0 %v1078_v6 }
   0xf   :  { %911 = vmatpush3.bf16.msra.mxu0 %v1079_v7 }
  0x10   :  { %912 = vmatprep.subr.bf16.mxu0 %v1080_v8 }
  0x13   :  { %913 = vmatpush3.bf16.msra.mxu0 %v1081_v9 }
  0x14   :  { %914 = vmatprep.subr.bf16.mxu0 %v1082_v10 }
  0x15   :  { %14 = vsyncpa [#allocation3], 0  ;;  %v1085_v16 = vld [vmem:[%s1471_s1 + $0x30] sm:$0xff]   ;;  %v1086_v17 = vld [vmem:[%s1471_s1 + $0x78] sm:$0xff]   ;;  %v1124_v22 = vmov 0.0   ;;  %vm321_vm0 = vcmask 130048  }
  0x16   :  { %v1087_v18 = vld [vmem:[%s1471_s1 + $0x38] sm:$0xff]   ;;  %v34_v19 = vld [vmem:[%s1470_s0] sm:$0xff]  ;;  %v36_v20 = vld [vmem:[%s1470_s0 + $0x10] sm:$0xff]  ;;  %v1125_v28 = vmov 0   ;;  %vm786_vm1 = vcmask 523264  }
  0x17   :  { %915 = vmatpush3.bf16.msra.mxu0 %v1083_v13  ;;  %v38_v21 = vpack.c.bf16 %v36_v20, %v34_v19  ;;  %v640_v23 = vld [vmem:[%s1477_s7] sm:$0xff]  ;;  %v641_v25 = vld [vmem:[%s1477_s7 + $0x8] sm:$0xff]  ;;  %v227_v27 = vld [vmem:[%s1475_s5 + $0x10] sm:$0xff]  ;;  %1070 = vset.pattern.permute.xlu0 %v1125_v28 }
  0x18   :  { %916 = vmatprep.subr.bf16.mxu0 %v1084_v15  ;;  %v209_v24 = vld [vmem:[%s1474_s4] sm:$0xff]  ;;  %1071 = vset.pattern.permute.xlu1 %v1125_v28  ;;  %v226_v29 = vld [vmem:[%s1475_s5 + $0x8] sm:$0xff]  ;;  %v228_v30 = vld [vmem:[%s1475_s5 + $0x18] sm:$0xff] }
  0x19   :  { %966 = vmatprep.mubr.msk.f32.mxu1 %vm321_vm0, %v209_v24  ;;  %v225_v26 = vld [vmem:[%s1475_s5] sm:$0xff]  ;;  %253 = vperm.xlu1 %1071, %v227_v27   ;;  %v230_v32 = vld [vmem:[%s1475_s5 + $0x28] sm:$0xff]  ;;  %v231_v33 = vld [vmem:[%s1475_s5 + $0x30] sm:$0xff] }
  0x1a   :  { %243 = vperm.xlu0 %1070, %v225_v26   ;;  %v229_v31 = vld [vmem:[%s1475_s5 + $0x20] sm:$0xff]  ;;  %v232_v34 = vld [vmem:[%s1475_s5 + $0x38] sm:$0xff]  ;;  %v234_v36 = vld [vmem:[%s1475_s5 + $0x48] sm:$0xff] }
  0x1b   :  { %917 = vmatpush3.bf16.msra.mxu0 %v1085_v16  ;;  %v233_v35 = vld [vmem:[%s1475_s5 + $0x40] sm:$0xff]  ;;  %v235_v37 = vld [vmem:[%s1475_s5 + $0x50] sm:$0xff]  ;;  %v236_v38 = vld [vmem:[%s1475_s5 + $0x58] sm:$0xff] }
  0x1c   :  { %918 = vmatprep.subr.bf16.mxu0 %v1086_v17  ;;  %v237_v39 = vld [vmem:[%s1475_s5 + $0x60] sm:$0xff]  ;;  %v238_v40 = vld [vmem:[%s1475_s5 + $0x68] sm:$0xff]  ;;  %v239_v41 = vld [vmem:[%s1475_s5 + $0x70] sm:$0xff] }
  0x1d   :  { %258 = vperm.xlu1 %1071, %v228_v30   ;;  %v240_v42 = vld [vmem:[%s1475_s5 + $0x78] sm:$0xff]  ;;  %v642_v43 = vld [vmem:[%s1478_s8] sm:$0xff]  ;;  %v643_v44 = vld [vmem:[%s1478_s8 + $0x8] sm:$0xff] }
  0x1e   :  { %248 = vperm.xlu0 %1070, %v226_v29   ;;  %v210_v52 = vld [vmem:[%s1474_s4 + $0x8] sm:$0xff]  ;;  %v211_v53 = vld [vmem:[%s1474_s4 + $0x10] sm:$0xff]  ;;  %v212_v54 = vld [vmem:[%s1474_s4 + $0x18] sm:$0xff] }
  0x1f   :  { %919 = vmatpush3.bf16.msra.mxu0 %v1087_v18  ;;  %v213_v55 = vld [vmem:[%s1474_s4 + $0x20] sm:$0xff]  ;;  %v214_v56 = vld [vmem:[%s1474_s4 + $0x28] sm:$0xff]  ;;  %v215_v57 = vld [vmem:[%s1474_s4 + $0x30] sm:$0xff] }
  0x20   :  { %1062 = vmatprep.subr.bf16.mxu0 %v39_v14  ;;  %v216_v58 = vld [vmem:[%s1474_s4 + $0x38] sm:$0xff]  ;;  %v217_v59 = vld [vmem:[%s1474_s4 + $0x40] sm:$0xff]  ;;  %v218_v60 = vld [vmem:[%s1474_s4 + $0x48] sm:$0xff] }
  0x21   :  { %268 = vperm.xlu1 %1071, %v230_v32   ;;  %v219_v61 = vld [vmem:[%s1474_s4 + $0x50] sm:$0xff]  ;;  %v220_v62 = vld [vmem:[%s1474_s4 + $0x58] sm:$0xff]  ;;  %v221_v63 = vld [vmem:[%s1474_s4 + $0x60] sm:$0xff] }
  0x22   :  { %201 = vmatmul.mubr.bf16.vlgmr.msra.gmra.mrb[0].mxu0 %v38_v21  ;;  %263 = vperm.xlu0 %1070, %v229_v31   ;;  %v222_v0 = vld [vmem:[%s1474_s4 + $0x68] sm:$0xff]  ;;  %v223_v1 = vld [vmem:[%s1474_s4 + $0x70] sm:$0xff]  ;;  %v224_v2 = vld [vmem:[%s1474_s4 + $0x78] sm:$0xff] }
  0x23   :  { %1064 = vmatpush1.bf16.msra.mxu0 %v38_v21  ;;  %724 = vmatprep.mubr.f32.mxu0 %v1124_v22  ;;  %v563_v7 = vld [vmem:[%s1476_s6] sm:$0xff]  ;;  %v532_v17 = vld [vmem:[%s1473_s3 + $0x8] sm:$0xff]  ;;  %v534_v30 = vld [vmem:[%s1473_s3 + $0x18] sm:$0xff] }
  0x24   :  { %v531_v20 = vld [vmem:[%s1473_s3] sm:$0xff] }
  0x25   :  { %278 = vperm.xlu1 %1071, %v232_v34  }
  0x26   :  { %273 = vperm.xlu0 %1070, %v231_v33   ;;  %v533_v33 = vld [vmem:[%s1473_s3 + $0x10] sm:$0xff] }
  0x29   :  { %288 = vperm.xlu1 %1071, %v234_v36  }
  0x2a   :  { %893 = vmatmul.mubr.msk.f32.vlgmr.msra.gmra.mrb[4].mxu0 %vm321_vm0, %v640_v23  ;;  %283 = vperm.xlu0 %1070, %v233_v35  }
  0x2b   :  { %730 = vmatprep.mubr.f32.mxu0 %v1124_v22 }
  0x2d   :  { %298 = vperm.xlu1 %1071, %v236_v38  }
  0x2e   :  { %894 = vmatmul.mubr.msk.f32.gmra.mrb[6].mxu0 %vm321_vm0, %v641_v25  ;;  %293 = vperm.xlu0 %1070, %v235_v37  }
  0x31   :  { %308 = vperm.xlu1 %1071, %v238_v40  }
  0x32   :  { %303 = vperm.xlu0 %1070, %v237_v39  }
  0x35   :  { %318 = vperm.xlu1 %1071, %v240_v42   ;;  %v536_v42 = vld [vmem:[%s1473_s3 + $0x28] sm:$0xff] }
  0x36   :  { %313 = vperm.xlu0 %1070, %v239_v41  }
  0x39   :  { %651 = vperm.xlu1 %1071, %v643_v44  }
  0x3a   :  { %646 = vperm.xlu0 %1070, %v642_v43  }
  0x98   :  { %v254_v8 = vpop.permute.xlu1 %253 }
  0x99   :  { %v244_v9 = vpop.permute.xlu0 %243 }
  0x9c   :  { %v259_v10 = vpop.permute.xlu1 %258 }
  0x9d   :  { %v249_v11 = vpop.permute.xlu0 %248 }
  0xa0   :  { %v269_v12 = vpop.permute.xlu1 %268 }
  0xa1   :  { %v264_v13 = vpop.permute.xlu0 %263 }
  0xa4   :  { %v279_v21 = vpop.permute.xlu1 %278 }
  0xa5   :  { %v274_v24 = vpop.permute.xlu0 %273 }
  0xa8   :  { %v289_v40 = vpop.permute.xlu1 %288 }
  0xa9   :  { %v284_v44 = vpop.permute.xlu0 %283 }
  0xf5   :  { %v920_v45 = vpop.f32.mrb[0].mxu0 }
  0xf6   :  { %v921_v46 = vpop.f32.mrb[1].mxu0 }
  0xf7   :  { %v922_v47 = vadd.f32 %v921_v46, %v920_v45  ;;  %v923_v48 = vpop.f32.mrb[2].mxu0  ;;  %v535_v46 = vld [vmem:[%s1473_s3 + $0x20] sm:$0xff] }
  0xf8   :  { %v924_v49 = vpop.f32.mrb[3].mxu0 }
  0xf9   :  { %v925_v50 = vadd.f32 %v924_v49, %v923_v48 }
  0xfb   :  { %v1025_v51 = vpack.c.bf16 %v925_v50, %v922_v47 }
  0xfd   :  { %1026 = vmatprep.subr.bf16.mxu1 %v1025_v51  ;;  %v1367_v3 = vpop.f32.mrb[4].mxu0 }
  0xfe   :  { %1028 = vmatpush3.bf16.msra.mxu1 %v1025_v51  ;;  %v1369_v4 = vpop.f32.mrb[5].mxu0 }
 0x101   :  { %967 = vmatmul.mubr.msk.f32.vlgmr.msra.gmra.mrb[0].mxu1 %vm321_vm0, %v210_v52  ;;  %v1371_v5 = vpop.f32.mrb[6].mxu0 }
 0x102   :  { %969 = vmatprep.mubr.msk.f32.mxu1 %vm321_vm0, %v211_v53  ;;  %v1373_v6 = vpop.f32.mrb[7].mxu0 }
 0x105   :  { %970 = vmatmul.mubr.msk.f32.gmra.mrb[2].mxu1 %vm321_vm0, %v212_v54  ;;  %v538_v54 = vld [vmem:[%s1473_s3 + $0x38] sm:$0xff] }
 0x106   :  { %972 = vmatprep.mubr.msk.f32.mxu1 %vm321_vm0, %v213_v55 }
 0x109   :  { %973 = vmatmul.mubr.msk.f32.gmra.mrb[4].mxu1 %vm321_vm0, %v214_v56 }
 0x10a   :  { %975 = vmatprep.mubr.msk.f32.mxu1 %vm321_vm0, %v215_v57  ;;  %v537_v57 = vld [vmem:[%s1473_s3 + $0x30] sm:$0xff] }
 0x10d   :  { %976 = vmatmul.mubr.msk.f32.gmra.mrb[6].mxu1 %vm321_vm0, %v216_v58  ;;  %v299_v58 = vpop.permute.xlu1 %298 }
 0x10e   :  { %978 = vmatprep.mubr.msk.f32.mxu1 %vm321_vm0, %v217_v59 }
 0x111   :  { %979 = vmatmul.mubr.msk.f32.gmra.mrb[8].mxu1 %vm321_vm0, %v218_v60 }
 0x112   :  { %981 = vmatprep.mubr.msk.f32.mxu1 %vm321_vm0, %v219_v61 }
 0x115   :  { %982 = vmatmul.mubr.msk.f32.gmra.mrb[10].mxu1 %vm321_vm0, %v220_v62  ;;  %v294_v62 = vpop.permute.xlu0 %293 }
 0x116   :  { %984 = vmatprep.mubr.msk.f32.mxu1 %vm321_vm0, %v221_v63 }
 0x119   :  { %985 = vmatmul.mubr.msk.f32.gmra.mrb[12].mxu1 %vm321_vm0, %v222_v0 }
 0x11a   :  { %987 = vmatprep.mubr.msk.f32.mxu1 %vm321_vm0, %v223_v1 }
 0x11d   :  { %988 = vmatmul.mubr.msk.f32.gmra.mrb[14].mxu1 %vm321_vm0, %v224_v2 }
 0x11e   :  { %1022 = vmatprep.mubr.f32.mxu1 %v563_v7  ;;  %v540_v7 = vld [vmem:[%s1473_s3 + $0x48] sm:$0xff] }
 0x1d4   :  { %v968_v14 = vpop.f32.mrb[0].mxu1 }
 0x1d5   :  { %v442_v15 = vadd.f32 %v968_v14, %v249_v11  ;;  %v436_v16 = vpop.f32.mrb[1].mxu1 }
 0x1d6   :  { %v437_v18 = vadd.f32 %v436_v16, %v244_v9 }
 0x1d7   :  { %v516_v19 = vmax.f32 %v442_v15, 0.0 }
 0x1d8   :  { %v515_v22 = vmax.f32 %v437_v18, 0.0  ;;  %v971_v23 = vpop.f32.mrb[2].mxu1 }
 0x1d9   :  { %v548_v25 = vmul.f32 %v532_v17, %v516_v19  ;;  %v452_v26 = vadd.f32 %v971_v23, %v259_v10  ;;  %v446_v27 = vpop.f32.mrb[3].mxu1  ;;  %v539_v10 = vld [vmem:[%s1473_s3 + $0x40] sm:$0xff]  ;;  %v309_v17 = vpop.permute.xlu1 %308  ;;  %v542_v19 = vld [vmem:[%s1473_s3 + $0x58] sm:$0xff]  ;;  %v541_v23 = vld [vmem:[%s1473_s3 + $0x50] sm:$0xff] }
 0x1da   :  { %v547_v29 = vmul.f32 %v531_v20, %v515_v22  ;;  %v447_v31 = vadd.f32 %v446_v27, %v254_v8 }
 0x1db   :  { %v518_v32 = vmax.f32 %v452_v26, 0.0 }
 0x1dc   :  { %v517_v34 = vmax.f32 %v447_v31, 0.0  ;;  %v974_v35 = vpop.f32.mrb[4].mxu1  ;;  %v1029_v36 = vpack.c.bf16 %v548_v25, %v547_v29 }
 0x1dd   :  { %v550_v37 = vmul.f32 %v534_v30, %v518_v32  ;;  %v462_v38 = vadd.f32 %v974_v35, %v269_v12  ;;  %v456_v39 = vpop.f32.mrb[5].mxu1  ;;  %v544_v32 = vld [vmem:[%s1473_s3 + $0x68] sm:$0xff]  ;;  %v543_v35 = vld [vmem:[%s1473_s3 + $0x60] sm:$0xff] }
 0x1de   :  { %v549_v41 = vmul.f32 %v533_v33, %v517_v34  ;;  %v457_v43 = vadd.f32 %v456_v39, %v264_v13  ;;  %1030 = vmatprep.subr.bf16.mxu1 %v1029_v36 }
 0x1df   :  { %v520_v45 = vmax.f32 %v462_v38, 0.0  ;;  %1032 = vmatpush3.bf16.msra.mxu1 %v1029_v36  ;;  %v319_v36 = vpop.permute.xlu1 %318 }
 0x1e0   :  { %v519_v47 = vmax.f32 %v457_v43, 0.0  ;;  %v977_v48 = vpop.f32.mrb[6].mxu1  ;;  %v1033_v49 = vpack.c.bf16 %v550_v37, %v549_v41 }
 0x1e1   :  { %v552_v50 = vmul.f32 %v536_v42, %v520_v45  ;;  %v472_v51 = vadd.f32 %v977_v48, %v279_v21  ;;  %v466_v52 = vpop.f32.mrb[7].mxu1  ;;  %v304_v21 = vpop.permute.xlu0 %303  ;;  %v546_v45 = vld [vmem:[%s1473_s3 + $0x78] sm:$0xff]  ;;  %v545_v48 = vld [vmem:[%s1473_s3 + $0x70] sm:$0xff] }
 0x1e2   :  { %v551_v53 = vmul.f32 %v535_v46, %v519_v47  ;;  %v467_v55 = vadd.f32 %v466_v52, %v274_v24  ;;  %1034 = vmatprep.subr.bf16.mxu1 %v1033_v49 }
 0x1e3   :  { %v522_v56 = vmax.f32 %v472_v51, 0.0  ;;  %1036 = vmatpush3.bf16.msra.mxu1 %v1033_v49 }
 0x1e4   :  { %v521_v59 = vmax.f32 %v467_v55, 0.0  ;;  %v980_v60 = vpop.f32.mrb[8].mxu1  ;;  %v1037_v61 = vpack.c.bf16 %v552_v50, %v551_v53  ;;  %v564_v55 = vld [vmem:[%s1476_s6 + $0x8] sm:$0xff] }
 0x1e5   :  { %v554_v63 = vmul.f32 %v538_v54, %v522_v56  ;;  %v482_v0 = vadd.f32 %v980_v60, %v289_v40  ;;  %v476_v1 = vpop.f32.mrb[9].mxu1  ;;  %v314_v40 = vpop.permute.xlu0 %313  ;;  %v1090_v54 = vld [vmem:[%s1472_s2 + $0x4] ss:$8 sps:$4 sm:$0xff]   ;;  %v1088_v56 = vld [vmem:[%s1472_s2] ss:$8 sps:$4 sm:$0xff]  }
 0x1e6   :  { %v553_v2 = vmul.f32 %v537_v57, %v521_v59  ;;  %v477_v8 = vadd.f32 %v476_v1, %v284_v44  ;;  %1038 = vmatprep.subr.bf16.mxu1 %v1037_v61  ;;  %v1093_v57 = vld [vmem:[%s1472_s2 + $0x14] ss:$8 sps:$4 sm:$0xff]   ;;  %v1096_v59 = vld [vmem:[%s1472_s2 + $0x24] ss:$8 sps:$4 sm:$0xff]   ;;  %v1094_v60 = vld [vmem:[%s1472_s2 + $0x20] ss:$8 sps:$4 sm:$0xff]  }
 0x1e7   :  { %v524_v9 = vmax.f32 %v482_v0, 0.0  ;;  %1040 = vmatpush3.bf16.msra.mxu1 %v1037_v61  ;;  %v1099_v61 = vld [vmem:[%s1472_s2 + $0x34] ss:$8 sps:$4 sm:$0xff]  }
 0x1e8   :  { %v523_v11 = vmax.f32 %v477_v8, 0.0  ;;  %v983_v12 = vpop.f32.mrb[10].mxu1  ;;  %v1041_v13 = vpack.c.bf16 %v554_v63, %v553_v2  ;;  %v652_v2 = vpop.permute.xlu1 %651 }
 0x1e9   :  { %v556_v14 = vmul.f32 %v540_v7, %v524_v9  ;;  %v492_v15 = vadd.f32 %v983_v12, %v299_v58  ;;  %v486_v16 = vpop.f32.mrb[11].mxu1  ;;  %v1091_v58 = vld [vmem:[%s1472_s2 + $0x10] ss:$8 sps:$4 sm:$0xff]   ;;  %v647_v1 = vpop.permute.xlu0 %646 }
 0x1ea   :  { %v555_v18 = vmul.f32 %v539_v10, %v523_v11  ;;  %v487_v20 = vadd.f32 %v486_v16, %v294_v62  ;;  %1042 = vmatprep.subr.bf16.mxu1 %v1041_v13  ;;  %v727_v7 = vadd.f32 %v1367_v3, %v647_v1  ;;  %v729_v8 = vadd.f32 %v1369_v4, %v647_v1 }
 0x1eb   :  { %v526_v22 = vmax.f32 %v492_v15, 0.0  ;;  %1044 = vmatpush3.bf16.msra.mxu1 %v1041_v13  ;;  %v733_v10 = vadd.f32 %v1371_v5, %v652_v2  ;;  %v735_v13 = vadd.f32 %v1373_v6, %v652_v2 }
 0x1ec   :  { %v525_v24 = vmax.f32 %v487_v20, 0.0  ;;  %v986_v25 = vpop.f32.mrb[12].mxu1  ;;  %v1045_v26 = vpack.c.bf16 %v556_v14, %v555_v18 }
 0x1ed   :  { %v558_v27 = vmul.f32 %v542_v19, %v526_v22  ;;  %v502_v29 = vadd.f32 %v986_v25, %v309_v17  ;;  %v496_v30 = vpop.f32.mrb[13].mxu1 }
 0x1ee   :  { %v557_v31 = vmul.f32 %v541_v23, %v525_v24  ;;  %v497_v33 = vadd.f32 %v496_v30, %v304_v21  ;;  %1046 = vmatprep.subr.bf16.mxu1 %v1045_v26 }
 0x1ef   :  { %v528_v34 = vmax.f32 %v502_v29, 0.0  ;;  %1048 = vmatpush3.bf16.msra.mxu1 %v1045_v26 }
 0x1f0   :  { %v527_v37 = vmax.f32 %v497_v33, 0.0  ;;  %v989_v38 = vpop.f32.mrb[14].mxu1  ;;  %v1049_v39 = vpack.c.bf16 %v558_v27, %v557_v31 }
 0x1f1   :  { %v560_v41 = vmul.f32 %v544_v32, %v528_v34  ;;  %v512_v42 = vadd.f32 %v989_v38, %v319_v36  ;;  %v506_v43 = vpop.f32.mrb[15].mxu1 }
 0x1f2   :  { %v559_v44 = vmul.f32 %v543_v35, %v527_v37  ;;  %v507_v46 = vadd.f32 %v506_v43, %v314_v40  ;;  %1050 = vmatprep.subr.bf16.mxu1 %v1049_v39 }
 0x1f3   :  { %v530_v47 = vmax.f32 %v512_v42, 0.0  ;;  %1052 = vmatpush3.bf16.msra.mxu1 %v1049_v39 }
 0x1f4   :  { %v529_v49 = vmax.f32 %v507_v46, 0.0  ;;  %v1053_v50 = vpack.c.bf16 %v560_v41, %v559_v44 }
 0x1f5   :  { %v562_v51 = vmul.f32 %v546_v45, %v530_v47 }
 0x1f6   :  { %v561_v52 = vmul.f32 %v545_v48, %v529_v49  ;;  %1054 = vmatprep.subr.bf16.mxu1 %v1053_v50 }
 0x1f7   :  { %1056 = vmatpush3.bf16.msra.mxu1 %v1053_v50 }
 0x1f8   :  { %v1057_v53 = vpack.c.bf16 %v562_v51, %v561_v52 }
 0x1fa   :  { %1058 = vmatprep.subr.bf16.mxu1 %v1057_v53 }
 0x1fb   :  { %1060 = vmatpush3.bf16.msra.mxu1 %v1057_v53 }
 0x1fc   :  { %790 = vmatprep.subr.bf16.mxu1 %v1090_v54 }
 0x1fe   :  { %1023 = vmatmul.mubr.f32.vlgmr.msra.gmra.mrb[16].mxu1 %v564_v55 }
 0x1ff   :  { %791 = vmatpush1.bf16.msra.mxu1 %v1088_v56  ;;  %822 = vmatprep.mubr.bf16.mxu1 %v1125_v28  ;;  %v1097_v28 = vld [vmem:[%s1472_s2 + $0x30] ss:$8 sps:$4 sm:$0xff]   ;;  %s1126_s2 = smov [#allocation2]  }
 0x200   :  { %792 = vmatprep.subr.bf16.mxu1 %v1093_v57  ;;  %s850_s5 = sshll.u32 %s1126_s2, 4  ;;  %s851_s5 = int_to_ptr.vmem [resolvable:$true] %s850_s5 }
 0x201   :  { %s1100_s22 = scalar_lea.vmem %s851_s5, 512  ;;  %p1105_p1 = scmp.lt.s32.totalorder %s851_s5, %s851_s5 }
 0x202   :  { %p1101_p0 = scmp.ne.s32.totalorder %s851_s5, %s1100_s22  ;;  %p1106_p2 = scmp.lt.s32.totalorder %s1100_s22, %s1100_s22 }
 0x203   :  { %793 = vmatpush1.bf16.msra.mxu1 %v1091_v58 }
 0x204   :  { %794 = vmatprep.subr.bf16.mxu1 %v1096_v59  ;;  %p1107_p3 = por %p1106_p2, %p1105_p1 }
 0x206   :  { %p1108_p4 = pnand %p1107_p3, %p1101_p0 }
 0x207   :  { %795 = vmatpush1.bf16.msra.mxu1 %v1094_v60 }
 0x208   :  { %796 = vmatprep.subr.bf16.mxu1 %v1099_v61 }
 0x20b   :  { %797 = vmatpush1.bf16.msra.mxu1 %v1097_v28 }
 0x2d1   :  { %v1024_v62 = vpop.f32.mrb[16].mxu1 }
 0x2d2   :  { %v631_v63 = vpop.f32.mrb[17].mxu1 }
 0x2d3   :  { %v737_v0 = vpack.c.bf16 %v1024_v62, %v631_v63 }
 0x2d5   :  { %903 = vmatmul.mubr.msk.bf16.vlgmr.msra.gmra.mrb[20].mxu1 %vm786_vm1, %v737_v0 }
 0x3a8   :  { %v824_v9 = vpop.f32.mrb[20].mxu1 }
 0x3a9   :  { %v833_v11 = vadd.f32 %v824_v9, %v727_v7  ;;  %v826_v12 = vpop.f32.mrb[21].mxu1 }
 0x3aa   :  { %v834_v14 = vadd.f32 %v826_v12, %v729_v8  ;;  %v828_v15 = vpop.f32.mrb[22].mxu1 }
 0x3ab   :  { %v837_v16 = vmax.f32 %v833_v11, 0.0  ;;  %v835_v17 = vadd.f32 %v828_v15, %v733_v10  ;;  %v830_v18 = vpop.f32.mrb[23].mxu1 }
 0x3ac   :  { %v838_v19 = vmax.f32 %v834_v14, 0.0  ;;  %v836_v20 = vadd.f32 %v830_v18, %v735_v13 }
 0x3ad   :  { %841 = vst [vmem:[#allocation2] sm:$0xff] %v837_v16  ;;  %v839_v3 = vmax.f32 %v835_v17, 0.0 }
 0x3ae   :  { %842 = vst [vmem:[#allocation2 + $0x8] sm:$0xff] %v838_v19  ;;  %v840_v4 = vmax.f32 %v836_v20, 0.0 }
 0x3af   :  { %843 = vst [vmem:[#allocation2 + $0x10] sm:$0xff] %v839_v3 }
 0x3b0   :  { %844 = vst [vmem:[#allocation2 + $0x18] sm:$0xff] %v840_v4 }
 0x3b1   :  { %1111 = shalt.err (!%p1108_p4)
}
 0x3b2   :  { %s1112_s8 = scalar_lea.hbm %s1479_s9, 512 }
 0x3b3   :  { %p1113_p5 = scmp.ne.s32.totalorder %s1479_s9, %s1112_s8  ;;  %p1116_p6 = scmp.lt.u32.totalorder %s1112_s8, %s1479_s9 }
 0x3b5   :  { %p1118_p7 = pnand %p1116_p6, %p1113_p5 }
 0x3b7   :  { %1121 = shalt.err (!%p1118_p7)
}
 0x3b8   :  { %s1127_s28 = smov 256   ;;  %s1128_s29 = smov 16  }
 0x3b9   :  { %856 = dma.vmem_to_hbm [thread:$0]  %s851_s5, 512, %s1479_s9, [#allocation3], %s1127_s28, %s1127_s28, %s1128_s29  }
 0x3ba   :  { %1122 = dma.done.wait [#allocation3], 512  }
 0x3bb   :  { %1123 = vsyncadd [#allocation3], 4294966784 }
 0x3bc   :  { %860 = vsyncpa [#allocation3], 1 }

</bundles_post_ra>
